<compile_context>
chip_gen: v7x
topology: tpu7x:2x2x1
jax: 0.10.0
libtpu: 0.0.40
codegen_flags: <defaults>
</compile_context>

<pallas_src>
import functools

import jax
import jax.numpy as jnp
from jax import lax
from jax.experimental import pallas as pl
from jax.experimental.pallas import tpu as pltpu


def mlp3_kernel(x_ref, w1_ref, b1_ref, w2_ref, b2_ref, w3_ref, b3_ref, o_ref):
    # x tile arrives batch-major (tb, d_in); all compute is feature-major so
    # the batch dim lives on lanes (lane-dense intermediates and output).
    x = x_ref[...]                                            # (tb, d_in)
    # h1T = W1 @ x^T  (contract over d_in; rhs given transposed)
    h1 = lax.dot_general(w1_ref[...], x, (((1,), (1,)), ((), ())),
                         preferred_element_type=jnp.float32)  # (h1, tb)
    h1 = jnp.maximum(h1 + b1_ref[...], 0.0)
    # h2T = W2 @ h1T
    h2 = jnp.dot(w2_ref[...], h1,
                 preferred_element_type=jnp.float32)          # (h2, tb)
    h2 = jnp.maximum(h2 + b2_ref[...], 0.0)
    # yT = W3 @ h2T + b3   (no activation)
    h3 = jnp.dot(w3_ref[...], h2,
                 preferred_element_type=jnp.float32)          # (out, tb)
    o_ref[...] = (h3 + b3_ref[...]).astype(o_ref.dtype)


def _round_up(n, m):
    return ((n + m - 1) // m) * m


def _round_down(n, m):
    return (n // m) * m


@functools.partial(jax.jit, static_argnames=("tb",))
def mlp3_forward(x, w1, b1, w2, b2, w3, b3, *, tb=8192):
    """Pallas TPU forward for the 3-layer MLP (Net).

    x: (B, d_in). Weights in PyTorch layout (out_features, in_features),
    biases as (out_features, 1). Returns (B, 3) in x.dtype.
    """
    B, d_in = x.shape
    out_dim = w3.shape[0]
    out_dtype = x.dtype

    # ---- batch-tile sizing -------------------------------------------------
    # Batch goes on lanes inside the kernel, so tb must be a multiple of 128.
    tb = max(128, _round_down(int(tb), 128))
    b_pad = _round_up(B, 128)
    tb = min(tb, b_pad)
    # Keep >= 2 grid steps when there is enough batch, so the "parallel" axis
    # has something to shard across the two TensorCores on v7x.
    if b_pad >= 2 * 128:
        tb = min(tb, max(128, _round_down(b_pad // 2, 128)))
    # Rebalance tile size across the step count to minimize padding waste.
    steps = -(-b_pad // tb)
    tb = _round_up(-(-b_pad // steps), 128)
    b_pad = steps * tb

    if b_pad != B:
        x = jnp.pad(x, ((0, b_pad - B), (0, 0)))

    grid = (b_pad // tb,)

    # Parameters: constant index_maps -> loaded once, VMEM-resident.
    def resident(arr):
        return pl.BlockSpec(arr.shape, lambda i: (0, 0))

    in_specs = [
        pl.BlockSpec((tb, d_in), lambda i: (i, 0)),   # streamed x tile
        resident(w1), resident(b1),
        resident(w2), resident(b2),
        resident(w3), resident(b3),
    ]
    # Lane-dense (feature-major) output tile.
    out_specs = pl.BlockSpec((out_dim, tb), lambda i: (0, i))

    h1_dim, h2_dim = w1.shape[0], w2.shape[0]
    flops = 2 * b_pad * (d_in * h1_dim + h1_dim * h2_dim + h2_dim * out_dim)
    param_bytes = sum(p.size * p.dtype.itemsize
                      for p in (w1, b1, w2, b2, w3, b3))
    bytes_accessed = (x.size * x.dtype.itemsize
                      + out_dim * b_pad * jnp.dtype(out_dtype).itemsize
                      + param_bytes)

    y_t = pl.pallas_call(
        mlp3_kernel,
        out_shape=jax.ShapeDtypeStruct((out_dim, b_pad), out_dtype),
        grid=grid,
        in_specs=in_specs,
        out_specs=out_specs,
        compiler_params=pltpu.CompilerParams(
            dimension_semantics=("parallel",),
        ),
        cost_estimate=pl.CostEstimate(
            flops=flops, transcendentals=0, bytes_accessed=bytes_accessed),
    )(x, w1, b1, w2, b2, w3, b3)

    # Tiny (out_dim, B) -> (B, out_dim) transpose in the wrapper.
    return y_t[:, :B].T


def init_params(key, layers=(15, 10, 5), out=3, dtype=jnp.float32):
    """Deterministic PyTorch-style init; weights (out,in), biases (out,1)."""
    dims = [layers[0], layers[1], layers[2], out]
    params = []
    for i in range(3):
        fan_in, fan_out = dims[i], dims[i + 1]
        key, kw, kb = jax.random.split(key, 3)
        bound = 1.0 / float(fan_in) ** 0.5
        w = jax.random.uniform(kw, (fan_out, fan_in), dtype, -bound, bound)
        b = jax.random.uniform(kb, (fan_out, 1), dtype, -bound, bound)
        params.extend([w, b])
    return params


def reference_forward(x, w1, b1, w2, b2, w3, b3):
    h1 = jnp.maximum(x @ w1.T + b1[:, 0], 0.0)
    h2 = jnp.maximum(h1 @ w2.T + b2[:, 0], 0.0)
    return h2 @ w3.T + b3[:, 0]


if __name__ == "__main__":
    key = jax.random.PRNGKey(0)
    kx, kx2, kp = jax.random.split(key, 3)

    layers = (15, 10, 5)
    params = init_params(kp, layers=layers, out=3)

    # Small, non-tile-aligned batch -> exercises padding + single-step grid.
    B = 50
    x = jax.random.normal(kx, (B, layers[0]), jnp.float32)
    y = jax.block_until_ready(mlp3_forward(x, *params))
    y_ref = reference_forward(x, *params)
    assert y.shape == (B, 3)
    assert jnp.allclose(y, y_ref, atol=1e-4, rtol=1e-4), float(
        jnp.max(jnp.abs(y - y_ref)))

    # Larger batch -> multi-step grid (>= 2 parallel steps) + padding.
    B2 = 300
    x2 = jax.random.normal(kx2, (B2, layers[0]), jnp.float32)
    y2 = jax.block_until_ready(mlp3_forward(x2, *params))
    y2_ref = reference_forward(x2, *params)
    assert y2.shape == (B2, 3)
    assert jnp.allclose(y2, y2_ref, atol=1e-4, rtol=1e-4), float(
        jnp.max(jnp.abs(y2 - y2_ref)))

    print("KERNEL_OK")
</pallas_src>

<mosaic_0001>
module attributes {stable_mosaic.version = 11 : i64} {
  func.func @mlp3_kernel(%arg0: i32, %arg1: memref<128x15xf32, #tpu.memory_space<vmem>>, %arg2: memref<10x15xf32, #tpu.memory_space<vmem>>, %arg3: memref<10x1xf32, #tpu.memory_space<vmem>>, %arg4: memref<5x10xf32, #tpu.memory_space<vmem>>, %arg5: memref<5x1xf32, #tpu.memory_space<vmem>>, %arg6: memref<3x5xf32, #tpu.memory_space<vmem>>, %arg7: memref<3x1xf32, #tpu.memory_space<vmem>>, %arg8: memref<3x128xf32, #tpu.memory_space<vmem>>) attributes {dimension_semantics = [#tpu.dimension_semantics<parallel>], iteration_bounds = array<i64: 1>, scalar_prefetch = 0 : i64, scratch_operands = 0 : i64, tpu.core_type = #tpu.core_type<tc>, window_params = [{transform_indices = @transform_0, window_bounds = array<i64: 128, 15>}, {pipeline_mode = #tpu.pipeline_mode<synchronous>, transform_indices = @transform_1, window_bounds = array<i64: 10, 15>}, {pipeline_mode = #tpu.pipeline_mode<synchronous>, transform_indices = @transform_2, window_bounds = array<i64: 10, 1>}, {pipeline_mode = #tpu.pipeline_mode<synchronous>, transform_indices = @transform_3, window_bounds = array<i64: 5, 10>}, {pipeline_mode = #tpu.pipeline_mode<synchronous>, transform_indices = @transform_4, window_bounds = array<i64: 5, 1>}, {pipeline_mode = #tpu.pipeline_mode<synchronous>, transform_indices = @transform_5, window_bounds = array<i64: 3, 5>}, {pipeline_mode = #tpu.pipeline_mode<synchronous>, transform_indices = @transform_6, window_bounds = array<i64: 3, 1>}, {transform_indices = @transform_7, window_bounds = array<i64: 3, 128>}]} {
    %c0 = arith.constant 0 : index
    %c0_0 = arith.constant 0 : index
    %0 = vector.load %arg1[%c0, %c0_0] : memref<128x15xf32, #tpu.memory_space<vmem>>, vector<128x15xf32>
    %c0_1 = arith.constant 0 : index
    %c0_2 = arith.constant 0 : index
    %1 = vector.load %arg2[%c0_1, %c0_2] : memref<10x15xf32, #tpu.memory_space<vmem>>, vector<10x15xf32>
    %cst = arith.constant dense<0.000000e+00> : vector<10x128xf32>
    %2 = tpu.matmul %1, %0, %cst {dimension_numbers = #tpu.dot_dimension_numbers<[1], [1], [0], [0], [0, 0, 1, 0], [], []>} : vector<10x15xf32>, vector<128x15xf32>, vector<10x128xf32> -> vector<10x128xf32>
    %c0_3 = arith.constant 0 : index
    %c0_4 = arith.constant 0 : index
    %3 = vector.load %arg3[%c0_3, %c0_4] : memref<10x1xf32, #tpu.memory_space<vmem>>, vector<10x1xf32>
    %4 = vector.broadcast %3 : vector<10x1xf32> to vector<10x128xf32>
    %5 = arith.addf %2, %4 : vector<10x128xf32>
    %cst_5 = arith.constant 0.000000e+00 : f32
    %6 = vector.broadcast %cst_5 : f32 to vector<10x128xf32>
    %7 = arith.maximumf %5, %6 : vector<10x128xf32>
    %c0_6 = arith.constant 0 : index
    %c0_7 = arith.constant 0 : index
    %8 = vector.load %arg4[%c0_6, %c0_7] : memref<5x10xf32, #tpu.memory_space<vmem>>, vector<5x10xf32>
    %cst_8 = arith.constant dense<0.000000e+00> : vector<5x128xf32>
    %9 = tpu.matmul %8, %7, %cst_8 {dimension_numbers = #tpu.dot_dimension_numbers<[1], [0], [0], [1], [0, 0, 1, 1], [], []>} : vector<5x10xf32>, vector<10x128xf32>, vector<5x128xf32> -> vector<5x128xf32>
    %c0_9 = arith.constant 0 : index
    %c0_10 = arith.constant 0 : index
    %10 = vector.load %arg5[%c0_9, %c0_10] : memref<5x1xf32, #tpu.memory_space<vmem>>, vector<5x1xf32>
    %11 = vector.broadcast %10 : vector<5x1xf32> to vector<5x128xf32>
    %12 = arith.addf %9, %11 : vector<5x128xf32>
    %cst_11 = arith.constant 0.000000e+00 : f32
    %13 = vector.broadcast %cst_11 : f32 to vector<5x128xf32>
    %14 = arith.maximumf %12, %13 : vector<5x128xf32>
    %c0_12 = arith.constant 0 : index
    %c0_13 = arith.constant 0 : index
    %15 = vector.load %arg6[%c0_12, %c0_13] : memref<3x5xf32, #tpu.memory_space<vmem>>, vector<3x5xf32>
    %cst_14 = arith.constant dense<0.000000e+00> : vector<3x128xf32>
    %16 = tpu.matmul %15, %14, %cst_14 {dimension_numbers = #tpu.dot_dimension_numbers<[1], [0], [0], [1], [0, 0, 1, 1], [], []>} : vector<3x5xf32>, vector<5x128xf32>, vector<3x128xf32> -> vector<3x128xf32>
    %c0_15 = arith.constant 0 : index
    %c0_16 = arith.constant 0 : index
    %17 = vector.load %arg7[%c0_15, %c0_16] : memref<3x1xf32, #tpu.memory_space<vmem>>, vector<3x1xf32>
    %18 = vector.broadcast %17 : vector<3x1xf32> to vector<3x128xf32>
    %19 = arith.addf %16, %18 : vector<3x128xf32>
    %c0_17 = arith.constant 0 : index
    %c0_18 = arith.constant 0 : index
    %20 = vector.load %arg8[%c0_17, %c0_18] : memref<3x128xf32, #tpu.memory_space<vmem>>, vector<3x128xf32>
    tpu.vector_store %arg8[%c0_17, %c0_18], %19 {strides = array<i32>} : memref<3x128xf32, #tpu.memory_space<vmem>>, vector<3x128xf32>,
    return
  }
  func.func @transform_0(%arg0: i32) -> (i32, i32) {
    %c0_i32 = arith.constant 0 : i32
    %c0_i32_0 = arith.constant 0 : i32
    return %arg0, %c0_i32 : i32, i32
  }
  func.func @transform_1(%arg0: i32) -> (i32, i32) {
    %c0_i32 = arith.constant 0 : i32
    %c0_i32_0 = arith.constant 0 : i32
    %c0_i32_1 = arith.constant 0 : i32
    return %c0_i32, %c0_i32_0 : i32, i32
  }
  func.func @transform_2(%arg0: i32) -> (i32, i32) {
    %c0_i32 = arith.constant 0 : i32
    %c0_i32_0 = arith.constant 0 : i32
    %c0_i32_1 = arith.constant 0 : i32
    return %c0_i32, %c0_i32_0 : i32, i32
  }
  func.func @transform_3(%arg0: i32) -> (i32, i32) {
    %c0_i32 = arith.constant 0 : i32
    %c0_i32_0 = arith.constant 0 : i32
    %c0_i32_1 = arith.constant 0 : i32
    return %c0_i32, %c0_i32_0 : i32, i32
  }
  func.func @transform_4(%arg0: i32) -> (i32, i32) {
    %c0_i32 = arith.constant 0 : i32
    %c0_i32_0 = arith.constant 0 : i32
    %c0_i32_1 = arith.constant 0 : i32
    return %c0_i32, %c0_i32_0 : i32, i32
  }
  func.func @transform_5(%arg0: i32) -> (i32, i32) {
    %c0_i32 = arith.constant 0 : i32
    %c0_i32_0 = arith.constant 0 : i32
    %c0_i32_1 = arith.constant 0 : i32
    return %c0_i32, %c0_i32_0 : i32, i32
  }
  func.func @transform_6(%arg0: i32) -> (i32, i32) {
    %c0_i32 = arith.constant 0 : i32
    %c0_i32_0 = arith.constant 0 : i32
    %c0_i32_1 = arith.constant 0 : i32
    return %c0_i32, %c0_i32_0 : i32, i32
  }
  func.func @transform_7(%arg0: i32) -> (i32, i32) {
    %c0_i32 = arith.constant 0 : i32
    %c0_i32_0 = arith.constant 0 : i32
    return %c0_i32, %arg0 : i32, i32
  }
}

</mosaic_0001>

<bundles_post_ra>
// kernel: mlp3_forward.1
= control target key start
LH: loop header
LB: loop body
LE: loop exit
PB: predicated region body
PF: predicated region fallthrough
CT: control target
= control target key end

     0   :  { %vm56_vm0 = vcmask 121856   ;;  %v515_v3 = vmov 0   ;;  %v516_v30 = vmov 0.0|0.0   ;;  %vm517_vm2 = vmmov 0   ;;  %s677_s0 = inlined_call_operand.vmem [shape: f32[128,15], index: 0, kind: input, shape index: {}]   ;;  %s678_s1 = inlined_call_operand.vmem [shape: f32[10,15], index: 1, kind: input, shape index: {}]   ;;  %s679_s2 = inlined_call_operand.vmem [shape: f32[10,1], index: 2, kind: input, shape index: {}]   ;;  %s680_s4 = inlined_call_operand.vmem [shape: f32[5,1], index: 4, kind: input, shape index: {}]   ;;  %s681_s6 = inlined_call_operand.vmem [shape: f32[3,1], index: 6, kind: input, shape index: {}]   ;;  %s682_s3 = inlined_call_operand.vmem [shape: f32[5,10], index: 3, kind: input, shape index: {}]   ;;  %s683_s5 = inlined_call_operand.vmem [shape: f32[3,5], index: 5, kind: input, shape index: {}]   ;;  %s684_s7 = inlined_call_operand.vmem [shape: f32[3,128], index: 7, kind: output, shape index: {}]  }
   0x1   :  { %v26_v0 = vld [vmem:[%s677_s0] sm:$0xff]  ;;  %v27_v1 = vld [vmem:[%s677_s0 + $0x8] sm:$0xff]  ;;  %vm568_vm1 = vmpackc.low %vm56_vm0, %vm56_vm0  ;;  %513 = vset.pattern.permute.xlu0 %v515_v3  ;;  %514 = vset.pattern.permute.xlu1 %v515_v3  ;;  %v518_v31 = vmov 0.0   ;;  %vm199_vm3 = vcmask 1041408   ;;  %vm519_vm4 = vmmov 1   ;;  %vm195_vm6 = vcmask 80896  }
   0x2   :  { %v456_v4 = vpack.c.bf16 %v27_v1, %v26_v0  ;;  %v28_v5 = vld [vmem:[%s677_s0 + $0x10] sm:$0xff]  ;;  %v29_v6 = vld [vmem:[%s677_s0 + $0x18] sm:$0xff]  ;;  %v42_v8 = vld [vmem:[%s678_s1] sm:$0xff]  ;;  %504 = vmatprep.subr.bf16.mxu1 %v516_v30  ;;  %448 = vmatprep.mubr.msk.f32.mxu1 %vm517_vm2, %v518_v31  ;;  %vm285_vm7 = vcmask 1044480   ;;  %vm281_vm8 = vcmask 39936  }
   0x3   :  { %v462_v7 = vpack.c.bf16 %v29_v6, %v28_v5  ;;  %v30_v9 = vld [vmem:[%s677_s0 + $0x20] sm:$0xff]  ;;  %v31_v10 = vld [vmem:[%s677_s0 + $0x28] sm:$0xff]  ;;  %441 = vmatprep.mubr.msk.f32.mxu0 %vm56_vm0, %v42_v8  ;;  %v32_v14 = vld [vmem:[%s677_s0 + $0x30] sm:$0xff] }
   0x4   :  { %458 = vmatprep.subr.msk.bf16.mxu0 %vm568_vm1, %v456_v4  ;;  %v44_v11 = vld [vmem:[%s679_s2] sm:$0xff]  ;;  %v45_v12 = vld [vmem:[%s679_s2 + $0x8] sm:$0x3]  ;;  %v468_v13 = vpack.c.bf16 %v31_v10, %v30_v9  ;;  %v33_v15 = vld [vmem:[%s677_s0 + $0x38] sm:$0xff] }
   0x5   :  { %461 = vmatpush3.bf16.xpose.msk.msra.mxu0 %vm568_vm1, %v456_v4  ;;  %48 = vperm.xlu0 %513, %v44_v11   ;;  %v474_v16 = vpack.c.bf16 %v33_v15, %v32_v14  ;;  %v34_v17 = vld [vmem:[%s677_s0 + $0x40] sm:$0xff]  ;;  %v35_v18 = vld [vmem:[%s677_s0 + $0x48] sm:$0xff]  ;;  %v36_v20 = vld [vmem:[%s677_s0 + $0x50] sm:$0xff] }
   0x6   :  { %464 = vmatprep.subr.msk.bf16.mxu0 %vm568_vm1, %v462_v7  ;;  %v480_v19 = vpack.c.bf16 %v35_v18, %v34_v17  ;;  %v37_v21 = vld [vmem:[%s677_s0 + $0x58] sm:$0xff]  ;;  %v38_v23 = vld [vmem:[%s677_s0 + $0x60] sm:$0xff]  ;;  %v39_v24 = vld [vmem:[%s677_s0 + $0x68] sm:$0xff] }
   0x7   :  { %v486_v22 = vpack.c.bf16 %v37_v21, %v36_v20  ;;  %v492_v25 = vpack.c.bf16 %v39_v24, %v38_v23  ;;  %v40_v26 = vld [vmem:[%s677_s0 + $0x70] sm:$0xff]  ;;  %v41_v27 = vld [vmem:[%s677_s0 + $0x78] sm:$0xff]  ;;  %v43_v29 = vld [vmem:[%s678_s1 + $0x8] sm:$0x3] }
   0x8   :  { %v498_v28 = vpack.c.bf16 %v41_v27, %v40_v26  ;;  %v189_v32 = vld [vmem:[%s680_s4] sm:$0x1f]  ;;  %vm506_vm5 = vmpackc.low %vm199_vm3, %vm519_vm4 }
   0x9   :  { %53 = vperm.xlu0 %513, %v45_v12   ;;  %192 = vperm.xlu1 %514, %v189_v32   ;;  %v275_v33 = vld [vmem:[%s681_s6] sm:$0x7] }
   0xa   :  { %v188_v43 = vld [vmem:[%s682_s3] sm:$0x1f] }
   0xb   :  { %v274_v49 = vld [vmem:[%s683_s5] sm:$0x7] }
   0xd   :  { %467 = vmatpush3.bf16.xpose.msk.msra.mxu0 %vm568_vm1, %v462_v7  ;;  %278 = vperm.xlu1 %514, %v275_v33  }
   0xe   :  { %470 = vmatprep.subr.msk.bf16.mxu0 %vm568_vm1, %v468_v13 }
  0x15   :  { %473 = vmatpush3.bf16.xpose.msk.msra.mxu0 %vm568_vm1, %v468_v13 }
  0x16   :  { %476 = vmatprep.subr.msk.bf16.mxu0 %vm568_vm1, %v474_v16 }
  0x1d   :  { %479 = vmatpush3.bf16.xpose.msk.msra.mxu0 %vm568_vm1, %v474_v16 }
  0x1e   :  { %482 = vmatprep.subr.msk.bf16.mxu0 %vm568_vm1, %v480_v19 }
  0x25   :  { %485 = vmatpush3.bf16.xpose.msk.msra.mxu0 %vm568_vm1, %v480_v19 }
  0x26   :  { %488 = vmatprep.subr.msk.bf16.mxu0 %vm568_vm1, %v486_v22 }
  0x2d   :  { %491 = vmatpush3.bf16.xpose.msk.msra.mxu0 %vm568_vm1, %v486_v22 }
  0x2e   :  { %494 = vmatprep.subr.msk.bf16.mxu0 %vm568_vm1, %v492_v25 }
  0x35   :  { %497 = vmatpush3.bf16.xpose.msk.msra.mxu0 %vm568_vm1, %v492_v25 }
  0x36   :  { %500 = vmatprep.subr.msk.bf16.mxu0 %vm568_vm1, %v498_v28 }
  0x3d   :  { %503 = vmatpush3.bf16.xpose.msk.msra.mxu0 %vm568_vm1, %v498_v28 }
  0x44   :  { %442 = vmatmul.mubr.msk.f32.vlgmr.msra.gmra.mrb[0].mxu0 %vm56_vm0, %v43_v29 }
  0x84   :  { %v49_v34 = vpop.permute.xlu0 %48 }
  0x88   :  { %v54_v35 = vpop.permute.xlu0 %53  ;;  %v193_v44 = vpop.permute.xlu1 %192 }
  0x8c   :  { %v279_v50 = vpop.permute.xlu1 %278 }
 0x117   :  { %v443_v36 = vpop.f32.mrb[0].mxu0 }
 0x118   :  { %v183_v37 = vadd.f32 %v443_v36, %v54_v35  ;;  %v177_v38 = vpop.f32.mrb[1].mxu0 }
 0x119   :  { %v178_v39 = vadd.f32 %v177_v38, %v49_v34 }
 0x11a   :  { %v187_v40 = vmax.f32 %v183_v37, 0.0 }
 0x11b   :  { %v186_v41 = vmax.f32 %v178_v39, 0.0 }
 0x11d   :  { %v505_v42 = vpack.c.bf16 %v187_v40, %v186_v41 }
 0x11f   :  { %507 = vmatpush3.bf16.msk.msra.mxu1 %vm506_vm5, %v505_v42 }
 0x120   :  { %451 = vmatprep.subr.mxu1 %v518_v31 }
 0x122   :  { %449 = vmatmul.mubr.msk.f32.vlgmr.msra.gmra.mrb[0].mxu1 %vm195_vm6, %v188_v43 }
 0x123   :  { %453 = vmatprep.mubr.msk.f32.mxu1 %vm517_vm2, %v518_v31 }
 0x1f5   :  { %v269_v45 = vpop.f32.mrb[0].mxu1 }
 0x1f6   :  { %v270_v46 = vadd.f32 %v269_v45, %v193_v44  ;;  %v450_v47 = vpop.f32.mrb[1].mxu1 }
 0x1f8   :  { %v273_v48 = vmax.f32 %v270_v46, 0.0 }
 0x1fa   :  { %452 = vmatpush3.msk.msra.mxu1 %vm285_vm7, %v273_v48 }
 0x1fb   :  { %454 = vmatmul.mubr.msk.f32.vlgmr.msra.gmra.mrb[2].mxu1 %vm281_vm8, %v274_v49 }
 0x2ce   :  { %v355_v51 = vpop.f32.mrb[2].mxu1 }
 0x2cf   :  { %v356_v52 = vadd.f32 %v355_v51, %v279_v50  ;;  %v455_v53 = vpop.f32.mrb[3].mxu1 }
 0x2d1   :  { %359 = vst [vmem:[%s684_s7] sm:$0x7] %v356_v52 }

</bundles_post_ra>
